<compile_context>
chip_gen: v7x
topology: tpu7x:2x2x1
jax: 0.10.0
libtpu: 0.0.40
codegen_flags: <defaults>
</compile_context>

<pallas_src>
import functools

import jax
import jax.numpy as jnp
from jax import lax
from jax.experimental import pallas as pl
from jax.experimental.pallas import tpu as pltpu


def conv_block_kernel(x_ref, w_ref, b_ref, o_ref, *, K, conv_stride, L_out_k,
                      pool_K, pool_stride, L_pool):
    # x_ref: (Nb, C_in, L_pad)    bf16, native batch-major layout
    # w_ref: (K, C_out, C_in)     bf16
    # b_ref: (1, C_out, 1)        f32
    # o_ref: (Nb, C_out, L_pool)  output dtype
    Nb = x_ref.shape[0]
    C_in = x_ref.shape[1]
    C_out = w_ref.shape[1]

    # ---- Conv1d: K accumulated batched matmuls on per-k ref slices (no im2col slab) ----
    acc = None
    for k in range(K):
        if conv_stride == 1:
            xs = x_ref[:, :, k:k + L_out_k]                            # (Nb, C_in, L_out_k)
        else:
            xs = x_ref[:, :, pl.ds(k, L_out_k, stride=conv_stride)]    # strided load
        wk = jnp.broadcast_to(w_ref[k], (Nb, C_out, C_in))             # (Nb, C_out, C_in)
        contrib = lax.dot_general(
            wk, xs,
            dimension_numbers=(((2,), (1,)), ((0,), (0,))),            # batched matmul
            preferred_element_type=jnp.float32)                        # (Nb, C_out, L_out_k)
        acc = contrib if acc is None else acc + contrib

    # ---- bias + ReLU (f32, VPU) ----
    acc = jnp.maximum(acc + b_ref[...], 0.0)

    # ---- Dropout: eval-mode identity (no-op) ----
    # TODO(synk): training-mode dropout not implemented.

    # ---- MaxPool1d(pool_K, stride=pool_stride) along the lane axis ----
    W = L_pool * pool_stride
    if pool_K == pool_stride:
        # Non-overlapping windows (the module's configuration): one reshape + one reduce.
        pooled = acc[:, :, :W].reshape(Nb, C_out, L_pool, pool_K).max(axis=-1)
    else:
        # General case: max over shifted copies, then one strided pick via reshape.
        z = acc[:, :, 0:W]
        for m in range(1, pool_K):
            z = jnp.maximum(z, acc[:, :, m:m + W])
        if pool_stride == 1:
            pooled = z
        else:
            pooled = z.reshape(Nb, C_out, L_pool, pool_stride)[:, :, :, 0]

    # Result is already batch-major: store directly, no transpose needed.
    o_ref[...] = pooled.astype(o_ref.dtype)


def conv_block(x, w, b, *, stride, padding, dropout=0.0, block_n=None):
    """ConvBlock forward (eval mode).  x: (N, C_in, L); w: (C_out, C_in, K); b: (C_out,).

    Returns (N, C_out, L_pool).  Dropout is identity in eval mode; the module's BatchNorm
    is defined but unused in forward() and is intentionally omitted.
    """
    del dropout  # eval-mode dropout is the identity
    N, C_in, L = x.shape
    C_out, _, K = w.shape
    pool_K, pool_stride = K, 3                       # nn.MaxPool1d(kernel_size, stride=3)
    L_out = (L + 2 * padding - K) // stride + 1
    L_pool = (L_out - pool_K) // pool_stride + 1
    assert L_out >= 1 and L_pool >= 1

    # The kernel computes L_out_k >= L_out conv columns so the pooling windows can be read
    # with uniform-width slices; the extra columns come from zero padding and are never
    # selected by the pooling pick.
    L_out_k = max(L_out, (pool_K - 1) + L_pool * pool_stride)
    L_pad = max(L + 2 * padding, K + stride * (L_out_k - 1))

    # bf16 inputs (HBM-bandwidth bound kernel); pad + cast fuse into one wrapper pass.
    x_p = jnp.pad(x, ((0, 0), (0, 0), (padding, L_pad - L - padding))).astype(jnp.bfloat16)
    w_p = jnp.transpose(w, (2, 0, 1)).astype(jnp.bfloat16)       # (K, C_out, C_in)
    b_p = b.astype(jnp.float32).reshape(1, C_out, 1)

    # ---- per-grid-step VMEM footprint estimate (double-buffered I/O + f32 temporaries) ----
    def footprint(bn):
        return (2 * bn * C_in * L_pad * 2            # double-buffered bf16 input block
                + 2 * bn * C_out * L_pool * 4        # double-buffered output block
                + 3 * bn * C_out * L_out_k * 4)      # acc + pooling temporaries (f32)

    vmem_budget = 24 * 1024 * 1024                   # stay well under v7x's 64 MiB VMEM
    if block_n is None:
        divisors = [d for d in range(1, N + 1) if N % d == 0]
        fitting = [d for d in divisors if footprint(d) <= vmem_budget] or [1]
        # Prefer >=2 grid steps (DMA/compute overlap + both v7x TensorCores), largest block.
        multi = [d for d in fitting if N // d >= 2]
        block_n = max(multi) if multi else max(fitting)
    assert N % block_n == 0

    vmem_limit = int(min(48 * 1024 * 1024,
                         max(32 * 1024 * 1024, 2 * footprint(block_n))))

    kernel = functools.partial(
        conv_block_kernel, K=K, conv_stride=stride, L_out_k=L_out_k,
        pool_K=pool_K, pool_stride=pool_stride, L_pool=L_pool)

    flops = 2 * N * C_out * L_out_k * C_in * K
    bytes_accessed = (x_p.size * x_p.dtype.itemsize + w_p.size * w_p.dtype.itemsize
                      + b_p.size * 4 + N * C_out * L_pool * x.dtype.itemsize)

    return pl.pallas_call(
        kernel,
        out_shape=jax.ShapeDtypeStruct((N, C_out, L_pool), x.dtype),
        grid=(N // block_n,),
        in_specs=[
            pl.BlockSpec((block_n, C_in, L_pad), lambda n: (n, 0, 0)),
            pl.BlockSpec((K, C_out, C_in), lambda n: (0, 0, 0)),
            pl.BlockSpec((1, C_out, 1), lambda n: (0, 0, 0)),
        ],
        out_specs=pl.BlockSpec((block_n, C_out, L_pool), lambda n: (n, 0, 0)),
        compiler_params=pltpu.CompilerParams(
            dimension_semantics=("parallel",), vmem_limit_bytes=vmem_limit),
        cost_estimate=pl.CostEstimate(
            flops=flops, transcendentals=0, bytes_accessed=bytes_accessed),
    )(x_p, w_p, b_p)


def conv_block_reference(x, w, b, *, stride, padding):
    """Pure-JAX f32 reference matching PyTorch semantics (eval mode)."""
    y = lax.conv_general_dilated(
        x, w, (stride,), [(padding, padding)], dimension_numbers=("NCH", "OIH", "NCH"))
    y = jnp.maximum(y + b[None, :, None], 0.0)
    K = w.shape[2]
    L_out = y.shape[2]
    L_pool = (L_out - K) // 3 + 1
    windows = jnp.stack(
        [y[:, :, j: j + 3 * (L_pool - 1) + 1: 3] for j in range(K)], axis=-1)
    return windows.max(-1)


if __name__ == "__main__":
    # Module hyperparameters (act_fn is ignored by the module -- it hardcodes ReLU).
    in_channel, out_channel = 4, 8
    kernel_size, stride, padding = 3, 1, 1
    dropout = 0.1

    key = jax.random.PRNGKey(0)
    kx, kw, kb = jax.random.split(key, 3)

    # Deterministic param init (PyTorch-style uniform bound).
    bound = 1.0 / (in_channel * kernel_size) ** 0.5
    w = jax.random.uniform(
        kw, (out_channel, in_channel, kernel_size), jnp.float32, -bound, bound)
    b = jax.random.uniform(kb, (out_channel,), jnp.float32, -bound, bound)

    # Input: batch=2, channels=4, length=32 (NCL).
    x = jax.random.normal(kx, (2, in_channel, 32), jnp.float32)

    out = conv_block(x, w, b, stride=stride, padding=padding, dropout=dropout)
    out = jax.block_until_ready(out)

    ref = conv_block_reference(x, w, b, stride=stride, padding=padding)
    assert out.shape == ref.shape, (out.shape, ref.shape)
    # bf16 inputs -> tolerance loosened vs the f32 reference.
    assert jnp.allclose(out, ref, atol=2e-2, rtol=2e-2), (
        "mismatch vs reference, max abs err = %f" % float(jnp.max(jnp.abs(out - ref))))

    print("KERNEL_OK")
</pallas_src>

<mosaic_0001>
module attributes {stable_mosaic.version = 11 : i64} {
  func.func @conv_block_kernel(%arg0: i32, %arg1: memref<1x4x34xbf16, #tpu.memory_space<vmem>>, %arg2: memref<3x8x4xbf16, #tpu.memory_space<vmem>>, %arg3: memref<1x8x1xf32, #tpu.memory_space<vmem>>, %arg4: memref<1x8x10xf32, #tpu.memory_space<vmem>>) attributes {dimension_semantics = [#tpu.dimension_semantics<parallel>], iteration_bounds = array<i64: 2>, scalar_prefetch = 0 : i64, scratch_operands = 0 : i64, tpu.core_type = #tpu.core_type<tc>, window_params = [{transform_indices = @transform_0, window_bounds = array<i64: 1, 4, 34>}, {pipeline_mode = #tpu.pipeline_mode<synchronous>, transform_indices = @transform_1, window_bounds = array<i64: 3, 8, 4>}, {pipeline_mode = #tpu.pipeline_mode<synchronous>, transform_indices = @transform_2, window_bounds = array<i64: 1, 8, 1>}, {transform_indices = @transform_3, window_bounds = array<i64: 1, 8, 10>}]} {
    %c0 = arith.constant 0 : index
    %c0_0 = arith.constant 0 : index
    %c0_1 = arith.constant 0 : index
    %0 = vector.load %arg1[%c0, %c0_0, %c0_1] : memref<1x4x34xbf16, #tpu.memory_space<vmem>>, vector<1x4x32xbf16>
    %c0_2 = arith.constant 0 : index
    %c0_3 = arith.constant 0 : index
    %c0_4 = arith.constant 0 : index
    %1 = vector.load %arg2[%c0_2, %c0_3, %c0_4] : memref<3x8x4xbf16, #tpu.memory_space<vmem>>, vector<1x8x4xbf16>
    %2 = vector.shape_cast %1 : vector<1x8x4xbf16> to vector<8x4xbf16>
    %3 = vector.shape_cast %2 : vector<8x4xbf16> to vector<1x8x4xbf16>
    %cst = arith.constant dense<0.000000e+00> : vector<1x8x32xf32>
    %4 = tpu.matmul %3, %0, %cst {dimension_numbers = #tpu.dot_dimension_numbers<[2], [1], [1], [2], [0, 0, 0, 1, 1, 2], [0], [0]>} : vector<1x8x4xbf16>, vector<1x4x32xbf16>, vector<1x8x32xf32> -> vector<1x8x32xf32>
    %c0_5 = arith.constant 0 : index
    %c0_6 = arith.constant 0 : index
    %c1 = arith.constant 1 : index
    %5 = vector.load %arg1[%c0_5, %c0_6, %c1] : memref<1x4x34xbf16, #tpu.memory_space<vmem>>, vector<1x4x32xbf16>
    %c1_7 = arith.constant 1 : index
    %c0_8 = arith.constant 0 : index
    %c0_9 = arith.constant 0 : index
    %6 = vector.load %arg2[%c1_7, %c0_8, %c0_9] : memref<3x8x4xbf16, #tpu.memory_space<vmem>>, vector<1x8x4xbf16>
    %7 = vector.shape_cast %6 : vector<1x8x4xbf16> to vector<8x4xbf16>
    %8 = vector.shape_cast %7 : vector<8x4xbf16> to vector<1x8x4xbf16>
    %cst_10 = arith.constant dense<0.000000e+00> : vector<1x8x32xf32>
    %9 = tpu.matmul %8, %5, %cst_10 {dimension_numbers = #tpu.dot_dimension_numbers<[2], [1], [1], [2], [0, 0, 0, 1, 1, 2], [0], [0]>} : vector<1x8x4xbf16>, vector<1x4x32xbf16>, vector<1x8x32xf32> -> vector<1x8x32xf32>
    %10 = arith.addf %4, %9 : vector<1x8x32xf32>
    %c0_11 = arith.constant 0 : index
    %c0_12 = arith.constant 0 : index
    %c2 = arith.constant 2 : index
    %11 = vector.load %arg1[%c0_11, %c0_12, %c2] : memref<1x4x34xbf16, #tpu.memory_space<vmem>>, vector<1x4x32xbf16>
    %c2_13 = arith.constant 2 : index
    %c0_14 = arith.constant 0 : index
    %c0_15 = arith.constant 0 : index
    %12 = vector.load %arg2[%c2_13, %c0_14, %c0_15] : memref<3x8x4xbf16, #tpu.memory_space<vmem>>, vector<1x8x4xbf16>
    %13 = vector.shape_cast %12 : vector<1x8x4xbf16> to vector<8x4xbf16>
    %14 = vector.shape_cast %13 : vector<8x4xbf16> to vector<1x8x4xbf16>
    %cst_16 = arith.constant dense<0.000000e+00> : vector<1x8x32xf32>
    %15 = tpu.matmul %14, %11, %cst_16 {dimension_numbers = #tpu.dot_dimension_numbers<[2], [1], [1], [2], [0, 0, 0, 1, 1, 2], [0], [0]>} : vector<1x8x4xbf16>, vector<1x4x32xbf16>, vector<1x8x32xf32> -> vector<1x8x32xf32>
    %16 = arith.addf %10, %15 : vector<1x8x32xf32>
    %c0_17 = arith.constant 0 : index
    %c0_18 = arith.constant 0 : index
    %c0_19 = arith.constant 0 : index
    %17 = vector.load %arg3[%c0_17, %c0_18, %c0_19] : memref<1x8x1xf32, #tpu.memory_space<vmem>>, vector<1x8x1xf32>
    %18 = vector.broadcast %17 : vector<1x8x1xf32> to vector<1x8x32xf32>
    %19 = arith.addf %16, %18 : vector<1x8x32xf32>
    %cst_20 = arith.constant 0.000000e+00 : f32
    %20 = vector.broadcast %cst_20 : f32 to vector<1x8x32xf32>
    %21 = arith.maximumf %19, %20 : vector<1x8x32xf32>
    %22 = vector.extract_strided_slice %21 {offsets = [0, 0, 0], sizes = [1, 8, 30], strides = [1, 1, 1]} : vector<1x8x32xf32> to vector<1x8x30xf32>
    %23 = vector.shape_cast %22 : vector<1x8x30xf32> to vector<1x8x10x3xf32>
    %cst_21 = arith.constant dense<0xFF800000> : vector<1x8x10xf32>
    %24 = vector.multi_reduction <maximumf>, %23, %cst_21 [3] : vector<1x8x10x3xf32> to vector<1x8x10xf32>
    %c0_22 = arith.constant 0 : index
    %c0_23 = arith.constant 0 : index
    %c0_24 = arith.constant 0 : index
    %25 = vector.load %arg4[%c0_22, %c0_23, %c0_24] : memref<1x8x10xf32, #tpu.memory_space<vmem>>, vector<1x8x10xf32>
    tpu.vector_store %arg4[%c0_22, %c0_23, %c0_24], %24 {strides = array<i32>} : memref<1x8x10xf32, #tpu.memory_space<vmem>>, vector<1x8x10xf32>,
    return
  }
  func.func @transform_0(%arg0: i32) -> (i32, i32, i32) {
    %c0_i32 = arith.constant 0 : i32
    %c0_i32_0 = arith.constant 0 : i32
    %c0_i32_1 = arith.constant 0 : i32
    return %arg0, %c0_i32, %c0_i32_0 : i32, i32, i32
  }
  func.func @transform_1(%arg0: i32) -> (i32, i32, i32) {
    %c0_i32 = arith.constant 0 : i32
    %c0_i32_0 = arith.constant 0 : i32
    %c0_i32_1 = arith.constant 0 : i32
    %c0_i32_2 = arith.constant 0 : i32
    return %c0_i32, %c0_i32_0, %c0_i32_1 : i32, i32, i32
  }
  func.func @transform_2(%arg0: i32) -> (i32, i32, i32) {
    %c0_i32 = arith.constant 0 : i32
    %c0_i32_0 = arith.constant 0 : i32
    %c0_i32_1 = arith.constant 0 : i32
    %c0_i32_2 = arith.constant 0 : i32
    return %c0_i32, %c0_i32_0, %c0_i32_1 : i32, i32, i32
  }
  func.func @transform_3(%arg0: i32) -> (i32, i32, i32) {
    %c0_i32 = arith.constant 0 : i32
    %c0_i32_0 = arith.constant 0 : i32
    %c0_i32_1 = arith.constant 0 : i32
    return %arg0, %c0_i32, %c0_i32_0 : i32, i32, i32
  }
}

</mosaic_0001>

<bundles_post_ra>
// kernel: tpu_custom_call.1
= control target key start
LH: loop header
LB: loop body
LE: loop exit
PB: predicated region body
PF: predicated region fallthrough
CT: control target
= control target key end

     0   :  { %8 = vsyncpa [#allocation3], 0  ;;  %s1198_s0 = inlined_call_operand.vmem [shape: bf16[2,4,34], index: 0, kind: input, shape index: {}]   ;;  %s1199_s1 = inlined_call_operand.vmem [shape: bf16[3,8,4], index: 1, kind: input, shape index: {}]   ;;  %s1200_s2 = inlined_call_operand.vmem [shape: f32[1,8,1], index: 2, kind: input, shape index: {}]   ;;  %s1201_s3 = inlined_call_operand.hbm [shape: f32[2,8,10], index: 3, kind: output, shape index: {}]  }
   0x1   :  { %10 = vsyncpa [#allocation3 + $0x1], 0  ;;  %s1003_s12 = smov 0   ;;  %s1005_s13 = smov 0  }
   0x2   :  { %s1007_s14 = smov 0   ;;  %s1009_s15 = smov 0  }
   0x3 LB: > { %s1024_s16 = sadd.s32 4294967295, %s964_s15   ;;  %s805_s17 = sadd.s32 4294967294, %s964_s15   ;;  %s964_s15 = sphi %s1009_s15, %s1207_s15   ;;  %s960_s14 = sphi %s1007_s14, %s1206_s14   ;;  %s956_s13 = sphi %s1005_s13, %s1205_s13   ;;  %s952_s12 = sphi %s1003_s12, %s1204_s12  }
   0x4   : > { %s1028_s18 = sadd.s32 1, %s964_s15   ;;  %s91_s19 = sadd.s32 1, %s960_s14 }
   0x5   : > { %s88_s20 = ssub.s32 %s964_s15, %s1028_s18  ;;  %p101_p0 = scmp.ne.s32.totalorder %s960_s14, %s956_s13 }
   0x6   : > { %p89_p1 = scmp.eq.s32.totalorder %s88_s20, 0  ;;  %p102_p2 = scmp.eq.s32.totalorder %s1024_s16, 1 }
   0x7   : > { %p107_p3 = scmp.ne.s32.totalorder %s956_s13, %s952_s12  ;;  %p108_p4 = scmp.eq.s32.totalorder %s805_s17, 1 }
   0x8   : > { %s1039_s21 = scalar_select %p89_p1, %s960_s14, %s91_s19  }
   0x9   : > { %p1041_p5 = por %p102_p2, %p101_p0  ;;  %p1045_p6 = por %p108_p4, %p107_p3 }
   0xa   : > { %p808_p7 = scmp.ge.s32.totalorder %s964_s15, 1  ;;  %p139_p8 = scmp.lt.s32.totalorder %s964_s15, 3 }
   0xc   : > { %p140_p9 = pnand %p808_p7, %p139_p8 }
   0xd   : > { %p162_p10 = scmp.lt.s32.totalorder (!%p140_p9), %s1024_s16, 1  ;;  %v175_v0 = vlaneseq (!%p140_p9)  ;;  %v966_v1 = vmov (!%p140_p9), 1983009808   ;;  %v967_v3 = vmov (!%p140_p9), 0.0   ;;  %vm968_vm0 = vmmov (!%p140_p9), 0   ;;  %v335_v11 = vld [vmem:[%s1200_s2] sm:$0xff] (!%p140_p9) }
   0xe   : > { %143 = sbr.rel (%p140_p9) target bundleno = 703 (0x2bf), region = 32  ;;  %v173_v2 = vunpack.c.l.s4 (!%p140_p9), %v966_v1  ;;  %827 = vmatprep.subr.bf16.mxu0 (!%p140_p9), %v967_v3  ;;  %833 = vmatprep.subr.bf16.mxu1 (!%p140_p9), %v967_v3  ;;  %vm185_vm1 = vcmask (!%p140_p9), 1041408   ;;  %vm181_vm2 = vcmask (!%p140_p9), 31744   ;;  %v168_v10 = vld [vmem:[%s1199_s1] sm:$0xf] (!%p140_p9)  ;;  %s969_s6 = smov (!%p140_p9), 127  }
   0xf   : > { %v1056_v4 = vshrl.u32 (!%p140_p9), %v175_v0, 7  ;;  %829 = vmatprep.mubr.msk.bf16.mxu0 (!%p140_p9), %vm968_vm0, %v967_v3  ;;  %835 = vmatprep.mubr.msk.bf16.mxu1 (!%p140_p9), %vm968_vm0, %v967_v3  ;;  %v970_v12 = vmov (!%p140_p9), 0   ;;  %s971_s7 = smov (!%p140_p9), 126   ;;  %v811_v16 = vld [vmem:[%s1199_s1 + $0x4] sm:$0xf] (!%p140_p9)  ;;  %s972_s17 = smov (!%p140_p9), 122  }
  0x10   : > { %v174_v5 = vunpack.c.0.s8 (!%p140_p9), %v173_v2  ;;  %900 = vset.pattern.permute.xlu1 (!%p140_p9), %v970_v12  ;;  %901 = vset.pattern.permute.xlu0 (!%p140_p9), %v970_v12  ;;  %v814_v19 = vld [vmem:[%s1199_s1 + $0x8] sm:$0xf] (!%p140_p9)  ;;  %s973_s19 = smov (!%p140_p9), 125   ;;  %s974_s20 = smov (!%p140_p9), 116   ;;  %v981_v44 = vmov (!%p140_p9), 1934713408  }
  0x11   : > { %338 = vperm.xlu1 (!%p140_p9), %900, %v335_v11   ;;  %s977_s26 = smov (!%p140_p9), 113   ;;  %s978_s27 = smov (!%p140_p9), 104   ;;  %v438_v45 = vunpack.c.l.s4 (!%p140_p9), %v981_v44  ;;  %vm577_vm3 = vcmask (!%p140_p9), 17408   ;;  %vm573_vm4 = vcmask (!%p140_p9), 23552   ;;  %vm650_vm5 = vcmask (!%p140_p9), 130112  }
  0x12   : > { %v1066_v6 = vsub.s32 (!%p140_p9), %v174_v5, %v1056_v4  ;;  %s980_s29 = smov (!%p140_p9), 101   ;;  %s159_s30 = sand.u32 (!%p140_p9), 1, %s956_s13   ;;  %vm715_vm6 = vcmask (!%p140_p9), 1041409   ;;  %vm717_vm7 = vcmask (!%p140_p9), 1042434   ;;  %vm719_vm8 = vcmask (!%p140_p9), 1043459  }
  0x13   : > { %v439_v51 = vunpack.c.0.s8 (!%p140_p9), %v438_v45  ;;  %s1139_s4 = sshll.u32 (!%p140_p9), %s159_s30, 3  ;;  %vm721_vm9 = vcmask (!%p140_p9), 1044484   ;;  %vm723_vm10 = vcmask (!%p140_p9), 1045509   ;;  %vm725_vm11 = vcmask (!%p140_p9), 1046534   ;;  %s818_s5 = sshll.u32 (!%p140_p9), %s1024_s16, 7 }
  0x14   : > { %vm727_vm12 = vcmask (!%p140_p9), 1047559   ;;  %vm730_vm13 = vcmask (!%p140_p9), 80896   ;;  %s1154_s10 = scalar_lea.hbm (!%p140_p9), %s1201_s3, %s818_s5 }
  0x15   : > { %s163_s24 = scalar_select %p162_p10, %s1024_s16, 1  ;;  %v442_v1 = vsub.s32 %v439_v51, %v1056_v4 }
  0x16   : > { %s733_s16 = scalar_lea.sflag [#allocation3], %s159_s30 }
  0x17   : > { %s810_s25 = sshll.u32 %s163_s24, 1  ;;  %s975_s24 = smov 119  }
  0x18   : > { %s165_s28 = scalar_lea.vmem %s1198_s0, %s810_s25  ;;  %s976_s25 = smov 110  }
  0x19   : > { %v167_v7 = vld [vmem:[%s165_s28] sm:$0x3] }
  0x1a   : > { %v178_v8 = vrot.slane %v167_v7, %v1066_v6  ;;  %v233_v9 = vsel %vm185_vm1, %v167_v7, 0  ;;  %v815_v13 = vld.sshfl [vmem:[%s165_s28] sm:$0x3 pattern:$0x76325410]  ;;  %s979_s28 = smov 107  }
  0x1b   : > { %834 = vmatpush3.bf16.msra.mxu1 %v233_v9 }
  0x1c   : > { %179 = vrot.lane.b32.xlu0 %v178_v8, %s969_s6  ;;  %s161_s6 = scalar_lea.vmem [#allocation2], %s1139_s4 }
  0x1e   : > { %836 = vmatmul.mubr.msk.bf16.vlgmr.msra.gmra.mrb[0].mxu1 %vm181_vm2, %v168_v10 }
  0x20   : > { %286 = vrot.lane.b32.xlu0 %v815_v13, %s971_s7  ;;  %s746_s7 = sshll.u32 %s161_s6, 4  ;;  %s1156_s7 = int_to_ptr.vmem [resolvable:$true] %s746_s7 }
  0x21   : > { %s902_s11 = scalar_lea.vmem %s1156_s7, 128 }
  0x22   : > { %p903_p11 = scmp.ne.s32.totalorder %s1156_s7, %s902_s11 }
  0x24   : > { %p904_p12 = pnand %p903_p11, %p1041_p5 }
  0x26   : > { %p905_p13 = pneg %p904_p12 }
  0x8e   : > { %v180_v14 = vpop.permute.xlu0 %179 }
  0x8f   : > { %v187_v15 = vsel %vm185_vm1, %v180_v14, 0 }
  0x90   : > { %828 = vmatpush3.bf16.msra.mxu0 %v187_v15  ;;  %v339_v30 = vpop.permute.xlu1 %338 }
  0x91   : > { %839 = vmatprep.subr.bf16.mxu0 %v967_v3 }
  0x92   : > { %v287_v17 = vpop.permute.xlu0 %286 }
  0x93   : > { %v292_v18 = vsel %vm185_vm1, %v287_v17, 0  ;;  %830 = vmatmul.mubr.msk.bf16.vlgmr.msra.gmra.mrb[0].mxu0 %vm181_vm2, %v811_v16 }
  0x94   : > { %840 = vmatpush3.bf16.msra.mxu0 %v292_v18  ;;  %841 = vmatprep.mubr.msk.bf16.mxu0 %vm968_vm0, %v967_v3 }
  0x9b   : > { %842 = vmatmul.mubr.msk.bf16.vlgmr.msra.gmra.mrb[4].mxu0 %vm181_vm2, %v814_v19 }
  0xf1   : > { %v269_v20 = vpop.f32.mrb[0].mxu1 }
  0xf2   : > { %v837_v21 = vpop.f32.mrb[1].mxu1 }
  0xf3   : > { %v272_v22 = vpop.f32.mrb[2].mxu1 }
  0xf4   : > { %v838_v23 = vpop.f32.mrb[3].mxu1 }
 0x166   : > { %v223_v24 = vpop.f32.mrb[0].mxu0 }
 0x167   : > { %v831_v25 = vpop.f32.mrb[1].mxu0  ;;  %v270_v26 = vadd.f32 %v269_v20, %v223_v24 }
 0x168   : > { %v226_v27 = vpop.f32.mrb[2].mxu0 }
 0x169   : > { %v832_v28 = vpop.f32.mrb[3].mxu0 }
 0x16e   : > { %v328_v29 = vpop.f32.mrb[4].mxu0 }
 0x16f   : > { %v334_v31 = vadd.f32 %v328_v29, %v270_v26  ;;  %v843_v32 = vpop.f32.mrb[5].mxu0 }
 0x170   : > { %v331_v33 = vpop.f32.mrb[6].mxu0 }
 0x171   : > { %v341_v34 = vadd.f32 %v339_v30, %v334_v31  ;;  %v844_v35 = vpop.f32.mrb[7].mxu0 }
 0x173   : > { %v342_v36 = vmax.f32 %v341_v34, 0.0 }
 0x175   : > { %347 = vrot.lane.b32.xlu0 %v342_v36, %s972_s17  ;;  %344 = vrot.lane.b32.xlu1 %v342_v36, %s973_s19  ;;  %s982_s17 = smov [#allocation2]  }
 0x176   : > { %s906_s19 = sshll.u32 %s982_s17, 4  ;;  %s907_s19 = int_to_ptr.vmem [resolvable:$false] %s906_s19 }
 0x177   : > { %p909_p0 = scmp.lt.s32.totalorder %s1156_s7, %s907_s19 }
 0x179   : > { %353 = vrot.lane.b32.xlu0 %v342_v36, %s974_s20  ;;  %350 = vrot.lane.b32.xlu1 %v342_v36, %s975_s24  ;;  %s908_s20 = scalar_lea.vmem %s907_s19, 256 }
 0x17a   : > { %p910_p1 = scmp.lt.s32.totalorder %s908_s20, %s902_s11 }
 0x17c   : > { %p911_p2 = por %p910_p1, %p909_p0 }
 0x17d   : > { %359 = vrot.lane.b32.xlu0 %v342_v36, %s976_s25  ;;  %356 = vrot.lane.b32.xlu1 %v342_v36, %s977_s26 }
 0x17e   : > { %p912_p3 = pnand %p911_p2, %p905_p13 }
 0x181   : > { %365 = vrot.lane.b32.xlu0 %v342_v36, %s978_s27  ;;  %362 = vrot.lane.b32.xlu1 %v342_v36, %s979_s28 }
 0x185   : > { %368 = vrot.lane.b32.xlu1 %v342_v36, %s980_s29 }
 0x1e7   : > { %v348_v37 = vpop.permute.xlu0 %347  ;;  %v345_v38 = vpop.permute.xlu1 %344 }
 0x1e8   : > { %v371_v47 = vcombine.low %v342_v36, %v348_v37  ;;  %v372_v2 = vcombine.high %v342_v36, %v348_v37 }
 0x1ea   : > { %v1096_v56 = vrot.slane %v371_v47, %v1066_v6  ;;  %v386_v17 = vrot.slane %v372_v2, %v1066_v6 }
 0x1eb   : > { %v354_v39 = vpop.permute.xlu0 %353  ;;  %v351_v40 = vpop.permute.xlu1 %350 }
 0x1ec   : > { %v387_v43 = vcombine.low %v345_v38, %v351_v40  ;;  %v388_v58 = vcombine.high %v345_v38, %v351_v40 }
 0x1ee   : > { %v1091_v50 = vrot.slane %v387_v43, %v1066_v6  ;;  %v402_v11 = vrot.slane %v388_v58, %v1066_v6 }
 0x1ef   : > { %v360_v41 = vpop.permute.xlu0 %359  ;;  %v357_v42 = vpop.permute.xlu1 %356 }
 0x1f0   : > { %v403_v46 = vcombine.low %v354_v39, %v360_v41  ;;  %v404_v59 = vcombine.high %v354_v39, %v360_v41  ;;  %v436_v61 = vcombine.high %v1096_v56, %v1091_v50  ;;  %v451_v24 = vcombine.low %v386_v17, %v402_v11 }
 0x1f1   : > { %v435_v39 = vcombine.low %v1096_v56, %v1091_v50  ;;  %v452_v40 = vcombine.high %v386_v17, %v402_v11 }
 0x1f2   : > { %v411_v52 = vrot.slane %v403_v46, %v1066_v6  ;;  %v418_v12 = vrot.slane %v404_v59, %v1066_v6  ;;  %v450_v16 = vrot.slane %v436_v61, %v442_v1  ;;  %v459_v32 = vrot.slane %v451_v24, %v442_v1 }
 0x1f3   : > { %v363_v48 = vpop.permute.xlu1 %362  ;;  %v366_v53 = vpop.permute.xlu0 %365  ;;  %v466_v47 = vrot.slane %v452_v40, %v442_v1 }
 0x1f4   : > { %v419_v49 = vcombine.low %v357_v42, %v363_v48  ;;  %v420_v54 = vcombine.high %v357_v42, %v363_v48  ;;  %v514_v62 = vrot.slane %v366_v53, %v1066_v6  ;;  %v507_v13 = vcombine.high %v366_v53, %v967_v3 }
 0x1f5   : > { %v443_v48 = vrot.slane %v435_v39, %v442_v1 }
 0x1f6   : > { %v427_v55 = vrot.slane %v419_v49, %v1066_v6  ;;  %v434_v5 = vrot.slane %v420_v54, %v1066_v6  ;;  %v521_v25 = vrot.slane %v507_v13, %v1066_v6 }
 0x1f7   : > { %v369_v57 = vpop.permute.xlu1 %368 }
 0x1f8   : > { %v468_v60 = vcombine.high %v411_v52, %v427_v55  ;;  %v529_v63 = vrot.slane %v369_v57, %v1066_v6  ;;  %v522_v7 = vcombine.high %v369_v57, %v967_v3  ;;  %v483_v18 = vcombine.low %v418_v12, %v434_v5 }
 0x1f9   : > { %v467_v33 = vcombine.low %v411_v52, %v427_v55  ;;  %v484_v34 = vcombine.high %v418_v12, %v434_v5 }
 0x1fa   : > { %v537_v8 = vcombine.low %v514_v62, %v529_v63  ;;  %v538_v9 = vcombine.high %v514_v62, %v529_v63  ;;  %v482_v10 = vrot.slane %v468_v60, %v442_v1  ;;  %v536_v19 = vrot.slane %v522_v7, %v1066_v6 }
 0x1fb   : > { %v491_v27 = vrot.slane %v483_v18, %v442_v1  ;;  %v498_v41 = vrot.slane %v484_v34, %v442_v1  ;;  %v475_v42 = vrot.slane %v467_v33, %v442_v1 }
 0x1fc   : > { %v552_v14 = vrot.slane %v538_v9, %v442_v1  ;;  %v545_v15 = vrot.slane %v537_v8, %v442_v1  ;;  %v501_v22 = vcombine.low %v450_v16, %v482_v10  ;;  %v502_v26 = vcombine.high %v450_v16, %v482_v10 }
 0x1fd   : > { %v553_v31 = vcombine.low %v521_v25, %v536_v19  ;;  %v503_v35 = vcombine.low %v459_v32, %v491_v27  ;;  %v554_v38 = vcombine.high %v521_v25, %v536_v19  ;;  %v504_v45 = vcombine.high %v459_v32, %v491_v27 }
 0x1fe   : > { %v590_v20 = vsel %vm577_vm3, %v552_v14, -inf  ;;  %v578_v21 = vsel %vm577_vm3, %v545_v15, -inf  ;;  %v569_v23 = vcombine.high %v545_v15, %v967_v3  ;;  %v587_v28 = vsel %vm573_vm4, %v501_v22, -inf }
 0x1ff   : > { %591 = vmax.xlane.f32.xlu0 %v590_v20  ;;  %579 = vmax.xlane.f32.xlu1 %v578_v21  ;;  %v570_v30 = vcombine.high %v552_v14, %v967_v3  ;;  %v593_v36 = vsel %vm573_vm4, %v502_v26, -inf  ;;  %v561_v6 = vrot.slane %v553_v31, %v442_v1  ;;  %v599_v43 = vsel %vm573_vm4, %v503_v35, -inf }
 0x200   : > { %v584_v29 = vsel %vm577_vm3, %v569_v23, -inf  ;;  %v568_v46 = vrot.slane %v554_v38, %v442_v1  ;;  %v605_v49 = vsel %vm573_vm4, %v504_v45, -inf  ;;  %v505_v52 = vcombine.low %v466_v47, %v498_v41 }
 0x201   : > { %v596_v37 = vsel %vm577_vm3, %v570_v30, -inf  ;;  %v602_v44 = vsel %vm577_vm3, %v561_v6, -inf  ;;  %v499_v53 = vcombine.low %v443_v48, %v475_v42  ;;  %v506_v55 = vcombine.high %v466_v47, %v498_v41 }
 0x202   : > { %v614_v51 = vsel %vm577_vm3, %v568_v46, -inf  ;;  %v611_v50 = vsel %vm573_vm4, %v505_v52, -inf  ;;  %v500_v56 = vcombine.high %v443_v48, %v475_v42  ;;  %v571_v59 = vcombine.high %v561_v6, %v967_v3 }
 0x203   : > { %588 = vmax.xlane.f32.xlu1 %v587_v28  ;;  %585 = vmax.xlane.f32.xlu0 %v584_v29  ;;  %v574_v54 = vsel %vm573_vm4, %v499_v53, -inf  ;;  %v617_v57 = vsel %vm573_vm4, %v506_v55, -inf  ;;  %v572_v61 = vcombine.high %v568_v46, %v967_v3  ;;  %v640_v9 = vand.u32 127, %v175_v0 }
 0x204   : > { %v581_v58 = vsel %vm573_vm4, %v500_v56, -inf  ;;  %v608_v60 = vsel %vm577_vm3, %v571_v59, -inf }
 0x205   : > { %v620_v62 = vsel %vm577_vm3, %v572_v61, -inf  ;;  %v645_v12 = vadd.s32 4294967288, %v640_v9  ;;  %v643_v15 = vsub.s32 %v640_v9, %v1056_v4 }
 0x207   : > { %594 = vmax.xlane.f32.xlu1 %v593_v36  ;;  %597 = vmax.xlane.f32.xlu0 %v596_v37  ;;  %v648_v3 = vsub.s32 %v645_v12, %v1056_v4 }
 0x20b   : > { %600 = vmax.xlane.f32.xlu1 %v599_v43  ;;  %603 = vmax.xlane.f32.xlu0 %v602_v44 }
 0x20f   : > { %606 = vmax.xlane.f32.xlu1 %v605_v49  ;;  %615 = vmax.xlane.f32.xlu0 %v614_v51 }
 0x213   : > { %612 = vmax.xlane.f32.xlu1 %v611_v50  ;;  %575 = vmax.xlane.f32.xlu0 %v574_v54 }
 0x217   : > { %618 = vmax.xlane.f32.xlu1 %v617_v57  ;;  %582 = vmax.xlane.f32.xlu0 %v581_v58 }
 0x21b   : > { %609 = vmax.xlane.f32.xlu0 %v608_v60 }
 0x21f   : > { %621 = vmax.xlane.f32.xlu0 %v620_v62 }
 0x28c   : > { %v592_v63 = vpop.xlane.xlu0 %591  ;;  %v580_v1 = vpop.xlane.xlu1 %579 }
 0x28d   : > { %v649_v18 = vrot.slane %v580_v1, %v648_v3  ;;  %v668_v25 = vrot.slane %v592_v63, %v648_v3 }
 0x290   : > { %v589_v2 = vpop.xlane.xlu1 %588  ;;  %v586_v5 = vpop.xlane.xlu0 %585 }
 0x291   : > { %v664_v19 = vrot.slane %v589_v2, %v643_v15  ;;  %v659_v0 = vrot.slane %v586_v5, %v648_v3 }
 0x293   : > { %v669_v29 = vsel %vm650_vm5, %v668_v25, %v664_v19 }
 0x294   : > { %v595_v7 = vpop.xlane.xlu1 %594  ;;  %v598_v8 = vpop.xlane.xlu0 %597 }
 0x295   : > { %v673_v22 = vrot.slane %v595_v7, %v643_v15  ;;  %v677_v23 = vrot.slane %v598_v8, %v648_v3 }
 0x297   : > { %v678_v32 = vsel %vm650_vm5, %v677_v23, %v673_v22 }
 0x298   : > { %v601_v10 = vpop.xlane.xlu1 %600  ;;  %v604_v11 = vpop.xlane.xlu0 %603 }
 0x299   : > { %v682_v26 = vrot.slane %v601_v10, %v643_v15  ;;  %v686_v27 = vrot.slane %v604_v11, %v648_v3 }
 0x29b   : > { %v687_v36 = vsel %vm650_vm5, %v686_v27, %v682_v26 }
 0x29c   : > { %v616_v13 = vpop.xlane.xlu0 %615  ;;  %v607_v14 = vpop.xlane.xlu1 %606 }
 0x29d   : > { %v691_v33 = vrot.slane %v607_v14, %v643_v15  ;;  %v704_v41 = vrot.slane %v616_v13, %v648_v3 }
 0x2a0   : > { %v576_v16 = vpop.xlane.xlu0 %575  ;;  %v613_v20 = vpop.xlane.xlu1 %612 }
 0x2a1   : > { %v644_v17 = vrot.slane %v576_v16, %v643_v15  ;;  %v700_v37 = vrot.slane %v613_v20, %v643_v15 }
 0x2a3   : > { %v651_v4 = vsel %vm650_vm5, %v649_v18, %v644_v17  ;;  %v705_v46 = vsel %vm650_vm5, %v704_v41, %v700_v37 }
 0x2a4   : > { %v583_v21 = vpop.xlane.xlu0 %582  ;;  %v619_v6 = vpop.xlane.xlu1 %618 }
 0x2a5   : > { %v655_v24 = vrot.slane %v583_v21, %v643_v15  ;;  %v709_v44 = vrot.slane %v619_v6, %v643_v15 }
 0x2a7   : > { %v660_v28 = vsel %vm650_vm5, %v659_v0, %v655_v24 }
 0x2a8   : > { %v716_v30 = vsel %vm715_vm6, %v660_v28, %v651_v4  ;;  %v610_v31 = vpop.xlane.xlu0 %609 }
 0x2a9   : > { %v718_v34 = vsel %vm717_vm7, %v669_v29, %v716_v30  ;;  %v695_v35 = vrot.slane %v610_v31, %v648_v3 }
 0x2aa   : > { %v720_v38 = vsel %vm719_vm8, %v678_v32, %v718_v34 }
 0x2ab   : > { %v722_v39 = vsel %vm721_vm9, %v687_v36, %v720_v38  ;;  %v696_v40 = vsel %vm650_vm5, %v695_v35, %v691_v33 }
 0x2ac   : > { %v724_v42 = vsel %vm723_vm10, %v696_v40, %v722_v39  ;;  %v622_v43 = vpop.xlane.xlu0 %621 }
 0x2ad   : > { %v713_v45 = vrot.slane %v622_v43, %v648_v3  ;;  %v726_v48 = vsel %vm725_vm11, %v705_v46, %v724_v42 }
 0x2af   : > { %v714_v47 = vsel %vm650_vm5, %v713_v45, %v709_v44 }
 0x2b0   : > { %v728_v49 = vsel %vm727_vm12, %v714_v47, %v726_v48 }
 0x2b1   : > { %731 = vst.msk [vmem:[%s161_s6] sm:$0xff] %vm730_vm13, %v728_v49 }
 0x2b2   : > { %915 = shalt.err (!%p912_p3)
}
 0x2b3   : > { %s916_s24 = scalar_lea.hbm %s1154_s10, 128  ;;  %s920_s27 = scalar_lea.hbm %s1201_s3, 256 }
 0x2b4   : > { %p917_p4 = scmp.ne.s32.totalorder %s1154_s10, %s916_s24  ;;  %p921_p9 = scmp.lt.u32.totalorder %s1154_s10, %s1201_s3 }
 0x2b5   : > { %p922_p10 = scmp.lt.u32.totalorder %s920_s27, %s916_s24  ;;  %p924_p12 = scmp.lt.u32.totalorder %s916_s24, %s1154_s10 }
 0x2b6   : > { %p918_p7 = pnand %p917_p4, %p1041_p5 }
 0x2b7   : > { %p923_p11 = por %p922_p10, %p921_p9 }
 0x2b8   : > { %p919_p8 = pneg %p918_p7 }
 0x2b9   : > { %p925_p13 = por %p924_p12, %p923_p11 }
 0x2bb   : > { %p926_p0 = pnand %p925_p13, %p919_p8 }
 0x2bd   : > { %929 = shalt.err (!%p926_p0)
}
 0x2be   : > { %845 = dma.vmem_to_hbm [thread:$0]  (%p1041_p5), %s1156_s7, 128, %s1154_s10, %s733_s16  }
 0x2bf PF: > { %p851_p1 = scmp.ge.s32.totalorder %s964_s15, 2  ;;  %s758_s30 = sand.u32 1, %s952_s12  }
 0x2c0   : > { %s759_s4 = scalar_lea.sflag [#allocation3], %s758_s30 }
 0x2c1   : > { %p848_p2 = pnand %p851_p1, %p1045_p6 }
 0x2c3   : > { %947 = dma.done.wait (!%p848_p2), %s759_s4, 128  }
 0x2c4   : > { %949 = vsyncadd (!%p848_p2), %s759_s4, 4294967168  ;;  %p13_p3 = scmp.ge.s32.totalorder %s1028_s18, 4   ;;  %s1204_s12 = smov %s956_s13 }
 0x2c5   : > { %s1205_s13 = smov %s960_s14  ;;  %s1206_s14 = smov %s1039_s21 }
 0x2c6   : > { %s1207_s15 = smov %s1028_s18  ;;  %15 = sbr.rel (!%p13_p3) target bundleno = 3 (0x3), region = 69 }
 0x2cd   :  { %764 = vsyncpa [#allocation3], 1 }
 0x2ce   :  { %766 = vsyncpa [#allocation3 + $0x1], 1 }

</bundles_post_ra>
